<compile_context>
chip_gen: v5e
topology: v5e:2x2
jax: 0.10.0
libtpu: 0.0.40
codegen_flags: <defaults>
</compile_context>

<pallas_src>
import functools

import jax
import jax.numpy as jnp
from jax.experimental import pallas as pl
from jax.experimental.pallas import tpu as pltpu


def _round_up(n, m):
    return ((n + m - 1) // m) * m


# ----------------------------- Pallas kernel --------------------------------
def atomwise_kernel(idx_ref, rbf_ref, x_ref,
                    wr_ref, br_ref,
                    w1_ref, b1_ref,
                    w2_ref, b2_ref,
                    w3_ref, b3_ref,
                    out_ref, acc_ref,
                    *, lane_reduce_final, compute_dtype):
    a = pl.program_id(0)                 # atom-block index  (parallel)
    e = pl.program_id(1)                 # edge-chunk index  (arbitrary / reduction)
    n_e = pl.num_programs(1)
    TA = acc_ref.shape[0]
    TE = x_ref.shape[0]

    # ---- init persistent accumulator at the start of each atom block --------
    @pl.when(e == 0)
    def _():
        acc_ref[...] = jnp.zeros_like(acc_ref)

    # ---- lin_rbf on the edge chunk (MXU), filter in f32 (VPU) ----------------
    rbf_filter = jnp.dot(rbf_ref[...], wr_ref[...],
                         preferred_element_type=jnp.float32) + br_ref[...]   # (TE, C)
    edge_vals = (rbf_filter * x_ref[...].astype(jnp.float32)).astype(compute_dtype)

    # ---- scatter_add via transposed lane-dense one-hot: (TA,TE) @ (TE,C) -----
    # idx_ref is (1, TE) lane-major int32; padded edges carry -1 (never match).
    atom_ids = jax.lax.broadcasted_iota(jnp.int32, (TA, TE), 0) + a * TA
    onehot = (idx_ref[...] == atom_ids).astype(compute_dtype)                # (TA, TE)
    acc_ref[...] += jnp.dot(onehot, edge_vals,
                            preferred_element_type=jnp.float32)              # (TA, C) f32

    # ---- finalize: 3-layer MLP on the accumulated atom features --------------
    @pl.when(e == n_e - 1)
    def _():
        h = jnp.dot(acc_ref[...].astype(compute_dtype), w1_ref[...],
                    preferred_element_type=jnp.float32) + b1_ref[...]
        h = h * jax.nn.sigmoid(h)                                            # SiLU (EUP)
        h = jnp.dot(h.astype(compute_dtype), w2_ref[...],
                    preferred_element_type=jnp.float32) + b2_ref[...]
        h = h * jax.nn.sigmoid(h)                                            # SiLU (EUP)
        if lane_reduce_final:
            # num_target == 1: VPU multiply + lane reduce -> frees the MXU and
            # avoids an N=1 matmul drain. w3_ref is stored as (1, C).
            y = jnp.sum(h * w3_ref[...].astype(jnp.float32),
                        axis=-1, keepdims=True) + b3_ref[...]
        else:
            y = jnp.dot(h.astype(compute_dtype), w3_ref[...],
                        preferred_element_type=jnp.float32) + b3_ref[...]
        out_ref[...] = y.astype(out_ref.dtype)


# ------------------------------ wrapper --------------------------------------
def atomwise_forward(x, rbf, edge_index_0, num_atoms, params,
                     *, edge_tile=1024, atom_tile=256,
                     compute_dtype=jnp.bfloat16):
    """num_atoms must be a static Python int. Returns (num_atoms, num_target) f32."""
    E, C = x.shape
    R = rbf.shape[1]
    T = params["w3"].shape[1]
    cd = compute_dtype

    # Effective tiles: never larger than the (padded) problem itself.
    TE = min(edge_tile, _round_up(E, 128))
    TA = min(atom_tile, _round_up(num_atoms, 8))
    E_pad = _round_up(E, TE)
    A_pad = _round_up(num_atoms, TA)
    n_a, n_e = A_pad // TA, E_pad // TE

    # Lane-dense layouts: edge index (1, E) lane-major; padded edges -> idx = -1.
    x_p = jnp.zeros((E_pad, C), cd).at[:E].set(x.astype(cd))
    rbf_p = jnp.zeros((E_pad, R), cd).at[:E].set(rbf.astype(cd))
    idx_p = jnp.full((1, E_pad), -1, jnp.int32).at[0, :E].set(
        edge_index_0.astype(jnp.int32))

    lane_reduce_final = (T == 1)
    w3_arg = (params["w3"].T.astype(jnp.float32) if lane_reduce_final
              else params["w3"].astype(cd))               # (1, C) or (C, T)

    weight_args = (
        params["wr"].astype(cd), params["br"].astype(jnp.float32),
        params["w1"].astype(cd), params["b1"].astype(jnp.float32),
        params["w2"].astype(cd), params["b2"].astype(jnp.float32),
        w3_arg, params["b3"].astype(jnp.float32),
    )

    def const_spec(arr):
        # Full-array block, constant block index -> resident across the grid.
        return pl.BlockSpec(arr.shape, lambda a, e: (0, 0))

    in_specs = [
        pl.BlockSpec((1, TE), lambda a, e: (0, e)),    # edge index (lane-major)
        pl.BlockSpec((TE, R), lambda a, e: (e, 0)),    # rbf chunk
        pl.BlockSpec((TE, C), lambda a, e: (e, 0)),    # x chunk
    ] + [const_spec(w) for w in weight_args]

    out_specs = pl.BlockSpec((TA, T), lambda a, e: (a, 0))

    flops = int(2 * E_pad * R * C * n_a          # lin_rbf (re-done per atom block)
                + 2 * E_pad * A_pad * C          # one-hot scatter contraction
                + 2 * A_pad * C * C * 2          # two hidden linears
                + 2 * A_pad * C * max(T, 1))     # output projection
    bytes_accessed = int(
        x_p.size * x_p.dtype.itemsize + rbf_p.size * rbf_p.dtype.itemsize
        + idx_p.size * 4 + A_pad * T * 4
        + sum(int(w.size) * w.dtype.itemsize for w in weight_args))

    kernel = functools.partial(atomwise_kernel,
                               lane_reduce_final=lane_reduce_final,
                               compute_dtype=cd)

    out_padded = pl.pallas_call(
        kernel,
        out_shape=jax.ShapeDtypeStruct((A_pad, T), jnp.float32),
        grid_spec=pltpu.PrefetchScalarGridSpec(
            num_scalar_prefetch=0,
            grid=(n_a, n_e),
            in_specs=in_specs,
            out_specs=out_specs,
            scratch_shapes=[pltpu.VMEM((TA, C), jnp.float32)],
        ),
        compiler_params=pltpu.CompilerParams(
            dimension_semantics=("parallel", "arbitrary"),
            vmem_limit_bytes=64 * 1024 * 1024,
        ),
        cost_estimate=pl.CostEstimate(
            flops=flops, transcendentals=int(2 * A_pad * C),
            bytes_accessed=bytes_accessed),
    )(idx_p, rbf_p, x_p, *weight_args)

    return out_padded[:num_atoms]


# ------------------------- deterministic parameter init ----------------------
def glorot_ortho(key, fan_in, fan_out):
    """Glorot-scaled orthogonal init, stored (fan_in, fan_out) so y = x @ W + b."""
    rows, cols = max(fan_in, fan_out), min(fan_in, fan_out)
    m = jax.random.normal(key, (rows, cols), dtype=jnp.float32)
    q, _ = jnp.linalg.qr(m)                      # (rows, cols), orthonormal columns
    if fan_in < fan_out:
        q = q.T                                  # -> (fan_in, fan_out)
    scale = (jnp.sqrt(2.0 / (fan_in + fan_out))
             * jnp.sqrt(jnp.float32(max(fan_in, fan_out))))
    return (q * scale).astype(jnp.float32)


def init_params(key, in_channels, rbf_dim, num_target):
    ks = jax.random.split(key, 4)
    return {
        # weights stored (in, out); biases stored (1, out)
        "wr": glorot_ortho(ks[0], rbf_dim, in_channels),
        "br": jnp.zeros((1, in_channels), jnp.float32),
        "w1": glorot_ortho(ks[1], in_channels, in_channels),
        "b1": jnp.zeros((1, in_channels), jnp.float32),
        "w2": glorot_ortho(ks[2], in_channels, in_channels),
        "b2": jnp.zeros((1, in_channels), jnp.float32),
        "w3": glorot_ortho(ks[3], in_channels, num_target),
        "b3": jnp.zeros((1, num_target), jnp.float32),
    }


# --------------------------- pure-JAX reference -------------------------------
def atomwise_reference(x, rbf, edge_index_0, num_atoms, params):
    rbf_filter = rbf @ params["wr"] + params["br"]
    out = rbf_filter * x
    out = jax.ops.segment_sum(out, edge_index_0, num_segments=num_atoms)
    h = out @ params["w1"] + params["b1"]
    h = jax.nn.silu(h)
    h = h @ params["w2"] + params["b2"]
    h = jax.nn.silu(h)
    return h @ params["w3"] + params["b3"]


# ----------------------------------- main -------------------------------------
if __name__ == "__main__":
    in_channels = 128
    rbf_dim = 16
    num_target = 1
    num_edges = 400       # pads to 512 -> 4 edge chunks of 128 (exercises masking)
    num_atoms = 90        # pads to 128 -> 2 atom blocks of 64

    key = jax.random.PRNGKey(0)
    k_x, k_rbf, k_idx, k_params = jax.random.split(key, 4)

    x = jax.random.normal(k_x, (num_edges, in_channels), dtype=jnp.float32)
    rbf = jax.random.normal(k_rbf, (num_edges, rbf_dim), dtype=jnp.float32)
    edge_index_0 = jax.random.randint(k_idx, (num_edges,), 0, num_atoms,
                                      dtype=jnp.int32)
    params = init_params(k_params, in_channels, rbf_dim, num_target)

    ref = atomwise_reference(x, rbf, edge_index_0, num_atoms, params)

    # f32 compute path: validates grid / scatter / accumulation logic.
    out_f32 = atomwise_forward(x, rbf, edge_index_0, num_atoms, params,
                               edge_tile=128, atom_tile=64,
                               compute_dtype=jnp.float32)
    out_f32 = jax.block_until_ready(out_f32)
    assert out_f32.shape == (num_atoms, num_target)
    assert jnp.allclose(out_f32, ref, atol=5e-2, rtol=2e-2), \
        "Pallas kernel (f32) mismatch vs reference"

    # bf16 MXU-feed path (production config for v6e/v7x): looser tolerance since
    # edge values / weights are rounded to bf16 before f32 accumulation.
    out_bf16 = atomwise_forward(x, rbf, edge_index_0, num_atoms, params,
                                edge_tile=128, atom_tile=64,
                                compute_dtype=jnp.bfloat16)
    out_bf16 = jax.block_until_ready(out_bf16)
    assert out_bf16.shape == (num_atoms, num_target)
    assert jnp.allclose(out_bf16, ref, atol=2.5e-1, rtol=5e-2), \
        "Pallas kernel (bf16) mismatch vs reference"

    print("KERNEL_OK")
</pallas_src>

<mosaic_0001>
module attributes {stable_mosaic.version = 11 : i64} {
  func.func @atomwise_kernel(%arg0: i32, %arg1: i32, %arg2: memref<1x128xi32, #tpu.memory_space<vmem>>, %arg3: memref<128x16xf32, #tpu.memory_space<vmem>>, %arg4: memref<128x128xf32, #tpu.memory_space<vmem>>, %arg5: memref<16x128xf32, #tpu.memory_space<vmem>>, %arg6: memref<1x128xf32, #tpu.memory_space<vmem>>, %arg7: memref<128x128xf32, #tpu.memory_space<vmem>>, %arg8: memref<1x128xf32, #tpu.memory_space<vmem>>, %arg9: memref<128x128xf32, #tpu.memory_space<vmem>>, %arg10: memref<1x128xf32, #tpu.memory_space<vmem>>, %arg11: memref<1x128xf32, #tpu.memory_space<vmem>>, %arg12: memref<1x1xf32, #tpu.memory_space<vmem>>, %arg13: memref<64x1xf32, #tpu.memory_space<vmem>>, %arg14: memref<64x128xf32, #tpu.memory_space<vmem>>) attributes {dimension_semantics = [#tpu.dimension_semantics<parallel>, #tpu.dimension_semantics<arbitrary>], iteration_bounds = array<i64: 2, 4>, scalar_prefetch = 0 : i64, scratch_operands = 1 : i64, tpu.core_type = #tpu.core_type<tc>, window_params = [{transform_indices = @transform_0, window_bounds = array<i64: 1, 128>}, {transform_indices = @transform_1, window_bounds = array<i64: 128, 16>}, {transform_indices = @transform_2, window_bounds = array<i64: 128, 128>}, {pipeline_mode = #tpu.pipeline_mode<synchronous>, transform_indices = @transform_3, window_bounds = array<i64: 16, 128>}, {pipeline_mode = #tpu.pipeline_mode<synchronous>, transform_indices = @transform_4, window_bounds = array<i64: 1, 128>}, {pipeline_mode = #tpu.pipeline_mode<synchronous>, transform_indices = @transform_5, window_bounds = array<i64: 128, 128>}, {pipeline_mode = #tpu.pipeline_mode<synchronous>, transform_indices = @transform_6, window_bounds = array<i64: 1, 128>}, {pipeline_mode = #tpu.pipeline_mode<synchronous>, transform_indices = @transform_7, window_bounds = array<i64: 128, 128>}, {pipeline_mode = #tpu.pipeline_mode<synchronous>, transform_indices = @transform_8, window_bounds = array<i64: 1, 128>}, {pipeline_mode = #tpu.pipeline_mode<synchronous>, transform_indices = @transform_9, window_bounds = array<i64: 1, 128>}, {pipeline_mode = #tpu.pipeline_mode<synchronous>, transform_indices = @transform_10, window_bounds = array<i64: 1, 1>}, {transform_indices = @transform_11, window_bounds = array<i64: 64, 1>}]} {
    %c0_i32 = arith.constant 0 : i32
    %0 = arith.cmpi eq, %arg1, %c0_i32 : i32
    %1 = arith.extui %0 : i1 to i32
    %c0_i32_0 = arith.constant 0 : i32
    %2 = arith.cmpi ne, %1, %c0_i32_0 : i32
    scf.if %2 {
      %cst_16 = arith.constant 0.000000e+00 : f32
      %27 = vector.broadcast %cst_16 : f32 to vector<64x128xf32>
      %c0_17 = arith.constant 0 : index
      %c0_18 = arith.constant 0 : index
      %28 = vector.load %arg14[%c0_17, %c0_18] : memref<64x128xf32, #tpu.memory_space<vmem>>, vector<64x128xf32>
      tpu.vector_store %arg14[%c0_17, %c0_18], %27 {strides = array<i32>} : memref<64x128xf32, #tpu.memory_space<vmem>>, vector<64x128xf32>,
    } else {
    }
    %c0 = arith.constant 0 : index
    %c0_1 = arith.constant 0 : index
    %3 = vector.load %arg3[%c0, %c0_1] : memref<128x16xf32, #tpu.memory_space<vmem>>, vector<128x16xf32>
    %c0_2 = arith.constant 0 : index
    %c0_3 = arith.constant 0 : index
    %4 = vector.load %arg5[%c0_2, %c0_3] : memref<16x128xf32, #tpu.memory_space<vmem>>, vector<16x128xf32>
    %cst = arith.constant dense<0.000000e+00> : vector<128x128xf32>
    %5 = tpu.matmul %3, %4, %cst {dimension_numbers = #tpu.dot_dimension_numbers<[1], [0], [0], [1], [0, 0, 1, 1], [], []>} : vector<128x16xf32>, vector<16x128xf32>, vector<128x128xf32> -> vector<128x128xf32>
    %c0_4 = arith.constant 0 : index
    %c0_5 = arith.constant 0 : index
    %6 = vector.load %arg6[%c0_4, %c0_5] : memref<1x128xf32, #tpu.memory_space<vmem>>, vector<1x128xf32>
    %7 = vector.broadcast %6 : vector<1x128xf32> to vector<128x128xf32>
    %8 = arith.addf %5, %7 : vector<128x128xf32>
    %c0_6 = arith.constant 0 : index
    %c0_7 = arith.constant 0 : index
    %9 = vector.load %arg4[%c0_6, %c0_7] : memref<128x128xf32, #tpu.memory_space<vmem>>, vector<128x128xf32>
    %10 = arith.mulf %8, %9 : vector<128x128xf32>
    %11 = tpu.iota {dimensions = array<i32: 0>} : vector<64x128xi32>
    %c64_i32 = arith.constant 64 : i32
    %12 = arith.muli %arg0, %c64_i32 : i32
    %13 = vector.broadcast %12 : i32 to vector<64x128xi32>
    %14 = arith.addi %11, %13 : vector<64x128xi32>
    %c0_8 = arith.constant 0 : index
    %c0_9 = arith.constant 0 : index
    %15 = vector.load %arg2[%c0_8, %c0_9] : memref<1x128xi32, #tpu.memory_space<vmem>>, vector<1x128xi32>
    %16 = vector.broadcast %15 : vector<1x128xi32> to vector<64x128xi32>
    %17 = arith.cmpi eq, %16, %14 : vector<64x128xi32>
    %18 = arith.extui %17 : vector<64x128xi1> to vector<64x128xi32>
    %19 = arith.sitofp %18 : vector<64x128xi32> to vector<64x128xf32>
    %c0_10 = arith.constant 0 : index
    %c0_11 = arith.constant 0 : index
    %20 = vector.load %arg14[%c0_10, %c0_11] : memref<64x128xf32, #tpu.memory_space<vmem>>, vector<64x128xf32>
    %cst_12 = arith.constant dense<0.000000e+00> : vector<64x128xf32>
    %21 = tpu.matmul %19, %10, %cst_12 {dimension_numbers = #tpu.dot_dimension_numbers<[1], [0], [0], [1], [0, 0, 1, 1], [], []>} : vector<64x128xf32>, vector<128x128xf32>, vector<64x128xf32> -> vector<64x128xf32>
    %22 = arith.addf %20, %21 : vector<64x128xf32>
    %c0_13 = arith.constant 0 : index
    %c0_14 = arith.constant 0 : index
    %23 = vector.load %arg14[%c0_13, %c0_14] : memref<64x128xf32, #tpu.memory_space<vmem>>, vector<64x128xf32>
    tpu.vector_store %arg14[%c0_13, %c0_14], %22 {strides = array<i32>} : memref<64x128xf32, #tpu.memory_space<vmem>>, vector<64x128xf32>,
    %c3_i32 = arith.constant 3 : i32
    %24 = arith.cmpi eq, %arg1, %c3_i32 : i32
    %25 = arith.extui %24 : i1 to i32
    %c0_i32_15 = arith.constant 0 : i32
    %26 = arith.cmpi ne, %25, %c0_i32_15 : i32
    scf.if %26 {
      %c0_16 = arith.constant 0 : index
      %c0_17 = arith.constant 0 : index
      %27 = vector.load %arg14[%c0_16, %c0_17] : memref<64x128xf32, #tpu.memory_space<vmem>>, vector<64x128xf32>
      %c0_18 = arith.constant 0 : index
      %c0_19 = arith.constant 0 : index
      %28 = vector.load %arg7[%c0_18, %c0_19] : memref<128x128xf32, #tpu.memory_space<vmem>>, vector<128x128xf32>
      %cst_20 = arith.constant dense<0.000000e+00> : vector<64x128xf32>
      %29 = tpu.matmul %27, %28, %cst_20 {dimension_numbers = #tpu.dot_dimension_numbers<[1], [0], [0], [1], [0, 0, 1, 1], [], []>} : vector<64x128xf32>, vector<128x128xf32>, vector<64x128xf32> -> vector<64x128xf32>
      %c0_21 = arith.constant 0 : index
      %c0_22 = arith.constant 0 : index
      %30 = vector.load %arg8[%c0_21, %c0_22] : memref<1x128xf32, #tpu.memory_space<vmem>>, vector<1x128xf32>
      %31 = vector.broadcast %30 : vector<1x128xf32> to vector<64x128xf32>
      %32 = arith.addf %29, %31 : vector<64x128xf32>
      %33 = arith.negf %32 : vector<64x128xf32>
      %34 = math.exp %33 : vector<64x128xf32>
      %cst_23 = arith.constant 1.000000e+00 : f32
      %35 = vector.broadcast %cst_23 : f32 to vector<64x128xf32>
      %36 = arith.addf %35, %34 : vector<64x128xf32>
      %37 = arith.divf %35, %36 : vector<64x128xf32>
      %38 = arith.mulf %32, %37 : vector<64x128xf32>
      %c0_24 = arith.constant 0 : index
      %c0_25 = arith.constant 0 : index
      %39 = vector.load %arg9[%c0_24, %c0_25] : memref<128x128xf32, #tpu.memory_space<vmem>>, vector<128x128xf32>
      %cst_26 = arith.constant dense<0.000000e+00> : vector<64x128xf32>
      %40 = tpu.matmul %38, %39, %cst_26 {dimension_numbers = #tpu.dot_dimension_numbers<[1], [0], [0], [1], [0, 0, 1, 1], [], []>} : vector<64x128xf32>, vector<128x128xf32>, vector<64x128xf32> -> vector<64x128xf32>
      %c0_27 = arith.constant 0 : index
      %c0_28 = arith.constant 0 : index
      %41 = vector.load %arg10[%c0_27, %c0_28] : memref<1x128xf32, #tpu.memory_space<vmem>>, vector<1x128xf32>
      %42 = vector.broadcast %41 : vector<1x128xf32> to vector<64x128xf32>
      %43 = arith.addf %40, %42 : vector<64x128xf32>
      %44 = arith.negf %43 : vector<64x128xf32>
      %45 = math.exp %44 : vector<64x128xf32>
      %cst_29 = arith.constant 1.000000e+00 : f32
      %46 = vector.broadcast %cst_29 : f32 to vector<64x128xf32>
      %47 = arith.addf %46, %45 : vector<64x128xf32>
      %48 = arith.divf %46, %47 : vector<64x128xf32>
      %49 = arith.mulf %43, %48 : vector<64x128xf32>
      %c0_30 = arith.constant 0 : index
      %c0_31 = arith.constant 0 : index
      %50 = vector.load %arg11[%c0_30, %c0_31] : memref<1x128xf32, #tpu.memory_space<vmem>>, vector<1x128xf32>
      %51 = vector.broadcast %50 : vector<1x128xf32> to vector<64x128xf32>
      %52 = arith.mulf %49, %51 : vector<64x128xf32>
      %cst_32 = arith.constant dense<0.000000e+00> : vector<64xf32>
      %53 = vector.multi_reduction <add>, %52, %cst_32 [1] : vector<64x128xf32> to vector<64xf32>
      %54 = vector.shape_cast %53 : vector<64xf32> to vector<64x1xf32>
      %c0_33 = arith.constant 0 : index
      %c0_34 = arith.constant 0 : index
      %55 = vector.load %arg12[%c0_33, %c0_34] : memref<1x1xf32, #tpu.memory_space<vmem>>, vector<1x1xf32>
      %56 = vector.broadcast %55 : vector<1x1xf32> to vector<64x1xf32>
      %57 = arith.addf %54, %56 : vector<64x1xf32>
      %c0_35 = arith.constant 0 : index
      %c0_36 = arith.constant 0 : index
      %58 = vector.load %arg13[%c0_35, %c0_36] : memref<64x1xf32, #tpu.memory_space<vmem>>, vector<64x1xf32>
      tpu.vector_store %arg13[%c0_35, %c0_36], %57 {strides = array<i32>} : memref<64x1xf32, #tpu.memory_space<vmem>>, vector<64x1xf32>,
    } else {
    }
    return
  }
  func.func @transform_0(%arg0: i32, %arg1: i32) -> (i32, i32) {
    %c0_i32 = arith.constant 0 : i32
    %c0_i32_0 = arith.constant 0 : i32
    return %c0_i32, %arg1 : i32, i32
  }
  func.func @transform_1(%arg0: i32, %arg1: i32) -> (i32, i32) {
    %c0_i32 = arith.constant 0 : i32
    %c0_i32_0 = arith.constant 0 : i32
    return %arg1, %c0_i32 : i32, i32
  }
  func.func @transform_2(%arg0: i32, %arg1: i32) -> (i32, i32) {
    %c0_i32 = arith.constant 0 : i32
    %c0_i32_0 = arith.constant 0 : i32
    return %arg1, %c0_i32 : i32, i32
  }
  func.func @transform_3(%arg0: i32, %arg1: i32) -> (i32, i32) {
    %c0_i32 = arith.constant 0 : i32
    %c0_i32_0 = arith.constant 0 : i32
    %c0_i32_1 = arith.constant 0 : i32
    return %c0_i32, %c0_i32_0 : i32, i32
  }
  func.func @transform_4(%arg0: i32, %arg1: i32) -> (i32, i32) {
    %c0_i32 = arith.constant 0 : i32
    %c0_i32_0 = arith.constant 0 : i32
    %c0_i32_1 = arith.constant 0 : i32
    return %c0_i32, %c0_i32_0 : i32, i32
  }
  func.func @transform_5(%arg0: i32, %arg1: i32) -> (i32, i32) {
    %c0_i32 = arith.constant 0 : i32
    %c0_i32_0 = arith.constant 0 : i32
    %c0_i32_1 = arith.constant 0 : i32
    return %c0_i32, %c0_i32_0 : i32, i32
  }
  func.func @transform_6(%arg0: i32, %arg1: i32) -> (i32, i32) {
    %c0_i32 = arith.constant 0 : i32
    %c0_i32_0 = arith.constant 0 : i32
    %c0_i32_1 = arith.constant 0 : i32
    return %c0_i32, %c0_i32_0 : i32, i32
  }
  func.func @transform_7(%arg0: i32, %arg1: i32) -> (i32, i32) {
    %c0_i32 = arith.constant 0 : i32
    %c0_i32_0 = arith.constant 0 : i32
    %c0_i32_1 = arith.constant 0 : i32
    return %c0_i32, %c0_i32_0 : i32, i32
  }
  func.func @transform_8(%arg0: i32, %arg1: i32) -> (i32, i32) {
    %c0_i32 = arith.constant 0 : i32
    %c0_i32_0 = arith.constant 0 : i32
    %c0_i32_1 = arith.constant 0 : i32
    return %c0_i32, %c0_i32_0 : i32, i32
  }
  func.func @transform_9(%arg0: i32, %arg1: i32) -> (i32, i32) {
    %c0_i32 = arith.constant 0 : i32
    %c0_i32_0 = arith.constant 0 : i32
    %c0_i32_1 = arith.constant 0 : i32
    return %c0_i32, %c0_i32_0 : i32, i32
  }
  func.func @transform_10(%arg0: i32, %arg1: i32) -> (i32, i32) {
    %c0_i32 = arith.constant 0 : i32
    %c0_i32_0 = arith.constant 0 : i32
    %c0_i32_1 = arith.constant 0 : i32
    return %c0_i32, %c0_i32_0 : i32, i32
  }
  func.func @transform_11(%arg0: i32, %arg1: i32) -> (i32, i32) {
    %c0_i32 = arith.constant 0 : i32
    %c0_i32_0 = arith.constant 0 : i32
    return %arg0, %c0_i32 : i32, i32
  }
}

</mosaic_0001>

<bundles_post_ra>
// kernel: tpu_custom_call.1
= control target key start
LH: loop header
LB: loop body
LE: loop exit
PB: predicated region body
PF: predicated region fallthrough
CT: control target
= control target key end

     0   :  { %s2239_s0 = inlined_call_operand.vmem [shape: s32[1,512], index: 0, kind: input, shape index: {}]   ;;  %s2240_s1 = inlined_call_operand.vmem [shape: f32[512,16], index: 1, kind: input, shape index: {}]   ;;  %s2241_s2 = inlined_call_operand.vmem [shape: f32[512,128], index: 2, kind: input, shape index: {}]   ;;  %s2242_s3 = inlined_call_operand.vmem [shape: f32[16,128], index: 3, kind: input, shape index: {}]   ;;  %s2243_s4 = inlined_call_operand.vmem [shape: f32[1,128], index: 4, kind: input, shape index: {}]   ;;  %s2244_s5 = inlined_call_operand.hbm [shape: f32[128,128], index: 5, kind: input, shape index: {}]   ;;  %s2245_s6 = inlined_call_operand.vmem [shape: f32[1,128], index: 6, kind: input, shape index: {}]   ;;  %s2246_s7 = inlined_call_operand.hbm [shape: f32[128,128], index: 7, kind: input, shape index: {}]   ;;  %s2247_s8 = inlined_call_operand.vmem [shape: f32[1,128], index: 8, kind: input, shape index: {}]   ;;  %s2248_s9 = inlined_call_operand.vmem [shape: f32[1,128], index: 9, kind: input, shape index: {}]   ;;  %s2249_s10 = inlined_call_operand.<no memory space> [shape: f32[1,1], index: 10, kind: input, shape index: {}]   ;;  %s2250_s11 = inlined_call_operand.vmem [shape: f32[128,1], index: 11, kind: output, shape index: {}]  }
   0x1   :  { %2251 = sst [smem:[#allocation12_spill]] %s2244_s5  ;;  %v16_v0 = vstv %s2249_s10 }
   0x2   :  { %2252 = sst [smem:[#allocation13_spill]] %s2246_s7  ;;  %17 = vst [vmem:[#allocation3] sm:$0x1] %v16_v0 }
   0x3   :  { %18 = vsyncpa [#allocation5], 0 }
   0x4   :  { %19 = vsyncpa [#allocation7], 0  ;;  %s1808_s19 = smov 0   ;;  %s1810_s20 = smov 0  }
   0x5   :  { %s1812_s21 = smov 0   ;;  %s1814_s22 = smov 0  }
   0x6   :  { %s1816_s23 = smov 0  }
   0x7 LB: > { %s1378_s10 = sadd.s32 4294967295, %s1737_s23   ;;  %s34_s24 = sadd.s32 1, %s1729_s21  ;;  %s1737_s23 = sphi %s1816_s23, %s25_s23   ;;  %s1733_s22 = sphi %s1814_s22, %s2276_s22   ;;  %s1729_s21 = sphi %s1812_s21, %s2275_s21   ;;  %s1725_s20 = sphi %s1810_s20, %s2274_s20   ;;  %s1721_s19 = sphi %s1808_s19, %s2273_s19  }
   0x8   : > { %p35_p0 = scmp.ge.s32.totalorder %s34_s24, 4  ;;  %s37_s25 = sadd.s32 1, %s1733_s22 }
   0x9   : > { %p1380_p1 = scmp.ge.s32.totalorder %s1737_s23, 1  ;;  %p314_p2 = scmp.lt.s32.totalorder %s1737_s23, 9 }
   0xa   : > { %s2278_s24 = smov (%p35_p0, %s34_s24), 0  ;;  %s2280_s25 = smov (!%p35_p0, %s37_s25), %s1733_s22 }
   0xb   : > { %2253 = sst [smem:[#allocation10_spill]] %s2278_s24  ;;  %p1841_p3 = pnand %p1380_p1, %p314_p2 }
   0xc   : > { %p39_p4 = scmp.ge.s32.totalorder %s2280_s25, 2  ;;  %p1845_p5 = scmp.eq.s32.totalorder %s1378_s10, 0 }
   0xd   : > { %p1504_p6 = pneg %p1841_p3  ;;  %s2256_s5 = sld [smem:[#allocation12_spill]] }
   0xe   : > { %s2282_s25 = smov (%p39_p4, %s2280_s25), 0  ;;  %s1739_s12 = smov [#allocation4]  }
   0xf   : > { %2257 = sst [smem:[#allocation11_spill]] %s2282_s25  ;;  %s333_s13 = sshll.u32 %s1739_s12, 4  ;;  %s334_s13 = int_to_ptr.vmem [resolvable:$true] %s333_s13 }
  0x10   : > { %p1505_p7 = pnand %p1845_p5, %p1504_p6  ;;  %s1740_s14 = smov 128  }
  0x11   : > { %s1741_s15 = smov 8   ;;  %s2258_s7 = sld [smem:[#allocation13_spill]] }
  0x12   : > { %s1742_s10 = smov [#allocation6]  }
  0x13   : > { %s331_s30 = sshll.u32 %s2256_s5, 4  ;;  %s350_s24 = sshll.u32 %s1742_s10, 4  ;;  %s332_s30 = int_to_ptr.hbm [resolvable:$true] %s331_s30  ;;  %s351_s24 = int_to_ptr.vmem [resolvable:$true] %s350_s24 }
  0x14   : > { %1507 = dma.hbm_to_vmem [thread:$0]  (!%p1505_p7), %s332_s30, 2048, %s334_s13, [#allocation5], %s1740_s14, %s1740_s14, %s1741_s15  }
  0x15   : > { %399 = sbr.rel (%p1841_p3) target bundleno = 952 (0x3b8), region = 64 }
  0x17   : > { %s348_s18 = sshll.u32 %s2258_s7, 4  ;;  %s349_s18 = int_to_ptr.hbm [resolvable:$true] %s348_s18 }
  0x18   : > { %1510 = dma.hbm_to_vmem [thread:$0]  (!%p1505_p7), %s349_s18, 2048, %s351_s24, [#allocation7], %s1740_s14, %s1740_s14, %s1741_s15  }
  0x1a   : > { %1712 = dma.done.wait (%p1845_p5), [#allocation5], 2048  }
  0x1b   : > { %1714 = vsyncadd (%p1845_p5), [#allocation5], 4294965248 }
  0x1c   : > { %1716 = dma.done.wait (%p1845_p5), [#allocation7], 2048  }
  0x1d   : > { %1718 = vsyncadd (%p1845_p5), [#allocation7], 4294965248  ;;  %p453_p8 = scmp.lt.s32.totalorder %s1721_s19, 3  ;;  %s1387_s24 = sshll.u32 %s1721_s19, 4 }
  0x1e   : > { %p457_p9 = scmp.lt.s32.totalorder %s1387_s24, 63  ;;  %s1391_s26 = sshll.u32 %s1725_s20, 3 }
  0x1f   : > { %s1875_s28 = scalar_select %p453_p8, %s1721_s19, 3 }
  0x20   : > { %s2284_s24 = smov (!%p457_p9, %s1387_s24), 63  ;;  %p469_p10 = scmp.lt.s32.totalorder %s1391_s26, 15 }
  0x21   : > { %s455_s12 = scalar_lea.vmem %s2239_s0, %s1875_s28  ;;  %s1388_s13 = sshll.u32 %s2284_s24, 3 }
  0x22   : > { %s1884_s15 = scalar_lea.vmem %s2240_s1, %s1388_s13  ;;  %s1889_s18 = scalar_lea.vmem %s2241_s2, %s1388_s13 }
  0x23   : > { %s2286_s26 = smov (!%p469_p10, %s1391_s26), 15  ;;  %p1393_p11 = scmp.ne.s32.totalorder %s1721_s19, 0 }
  0x24   : > { %s1392_s10 = sshll.u32 %s2286_s26, 3 }
  0x25   : > { %s1894_s25 = scalar_lea.vmem %s2250_s11, %s1392_s10  ;;  %477 = sbr.rel (%p1393_p11) target bundleno = 51 (0x33), region = 76 }
  0x2a   : > { %v1743_v1 = vmov 0.0  }
  0x2b   : > { %478 = vst [vmem:[#allocation2 + $0x30] sm:$0xff] %v1743_v1 }
  0x2c   : > { %479 = vst [vmem:[#allocation2] sm:$0xff] %v1743_v1 }
  0x2d   : > { %480 = vst [vmem:[#allocation2 + $0x18] sm:$0xff] %v1743_v1 }
  0x2e   : > { %481 = vst [vmem:[#allocation2 + $0x10] sm:$0xff] %v1743_v1 }
  0x2f   : > { %482 = vst [vmem:[#allocation2 + $0x8] sm:$0xff] %v1743_v1 }
  0x30   : > { %483 = vst [vmem:[#allocation2 + $0x20] sm:$0xff] %v1743_v1 }
  0x31   : > { %484 = vst [vmem:[#allocation2 + $0x28] sm:$0xff] %v1743_v1 }
  0x32   : > { %485 = vst [vmem:[#allocation2 + $0x38] sm:$0xff] %v1743_v1 }
  0x33 PF: > { %v503_v2 = vld [vmem:[%s2242_s3 + $0x8] sm:$0xff]  ;;  %v502_v3 = vld [vmem:[%s2242_s3] sm:$0xff]  ;;  %v493_v4 = vld [vmem:[%s1884_s15 + $0x38] sm:$0xff]  ;;  %vm508_vm0 = vcmask 130048   ;;  %s1410_s13 = sshll.u32 %s1725_s20, 6  ;;  %p1427_p12 = scmp.ne.s32.totalorder %s1721_s19, 3 }
  0x34   : > { %1446 = vmatpush.msra.mxu2 %v503_v2  ;;  %571 = vmatpush.msra.mxu0 %v503_v2  ;;  %v486_v5 = vld [vmem:[%s1884_s15] sm:$0xff]  ;;  %v487_v7 = vld [vmem:[%s1884_s15 + $0x8] sm:$0xff]  ;;  %v488_v9 = vld [vmem:[%s1884_s15 + $0x10] sm:$0xff] }
  0x35   : > { %v494_v6 = vld [vmem:[%s1884_s15 + $0x40] sm:$0xff]  ;;  %v495_v8 = vld [vmem:[%s1884_s15 + $0x48] sm:$0xff]  ;;  %v496_v10 = vld [vmem:[%s1884_s15 + $0x50] sm:$0xff] }
  0x36   : > { %1447 = vmatpush.msra.mxu2 %v502_v3  ;;  %572 = vmatpush.msra.mxu0 %v502_v3  ;;  %v489_v11 = vld [vmem:[%s1884_s15 + $0x18] sm:$0xff]  ;;  %v490_v13 = vld [vmem:[%s1884_s15 + $0x20] sm:$0xff]  ;;  %v491_v15 = vld [vmem:[%s1884_s15 + $0x28] sm:$0xff] }
  0x37   : > { %1401 = vmatmul.msk.f32.vlgmr.msra.gmra.mxu2 %vm508_vm0, %v493_v4  ;;  %1394 = vmatmul.msk.f32.vlgmr.msra.gmra.mxu0 %vm508_vm0, %v486_v5  ;;  %v497_v12 = vld [vmem:[%s1884_s15 + $0x58] sm:$0xff]  ;;  %v498_v14 = vld [vmem:[%s1884_s15 + $0x60] sm:$0xff]  ;;  %v499_v16 = vld [vmem:[%s1884_s15 + $0x68] sm:$0xff]  ;;  %v654_v4 = vlaneseq }
  0x38   : > { %v492_v17 = vld [vmem:[%s1884_s15 + $0x30] sm:$0xff]  ;;  %v501_v19 = vld [vmem:[%s1884_s15 + $0x78] sm:$0xff]  ;;  %v1944_v33 = vld [vmem:[%s2243_s4] ss:$0 sm:$0xff] }
  0x39   : > { %v500_v18 = vld [vmem:[%s1884_s15 + $0x70] sm:$0xff]  ;;  %v637_v35 = vld [vmem:[%s1889_s18 + $0x78] sm:$0xff]  ;;  %v635_v42 = vld [vmem:[%s1889_s18 + $0x68] sm:$0xff] }
  0x3a   : > { %v636_v38 = vld [vmem:[%s1889_s18 + $0x70] sm:$0xff]  ;;  %v634_v45 = vld [vmem:[%s1889_s18 + $0x60] sm:$0xff]  ;;  %v633_v48 = vld [vmem:[%s1889_s18 + $0x58] sm:$0xff] }
  0x3b   : > { %v632_v51 = vld [vmem:[%s1889_s18 + $0x50] sm:$0xff]  ;;  %v631_v54 = vld [vmem:[%s1889_s18 + $0x48] sm:$0xff]  ;;  %v630_v58 = vld [vmem:[%s1889_s18 + $0x40] sm:$0xff] }
  0x3c   : > { %v629_v62 = vld [vmem:[%s1889_s18 + $0x38] sm:$0xff]  ;;  %v628_v63 = vld [vmem:[%s1889_s18 + $0x30] sm:$0xff]  ;;  %v627_v5 = vld [vmem:[%s1889_s18 + $0x28] sm:$0xff] }
  0x3f   : > { %1402 = vmatmul.msk.f32.gmra.mxu2 %vm508_vm0, %v494_v6  ;;  %1395 = vmatmul.msk.f32.gmra.mxu0 %vm508_vm0, %v487_v7  ;;  %v626_v7 = vld [vmem:[%s1889_s18 + $0x20] sm:$0xff] }
  0x47   : > { %1403 = vmatmul.msk.f32.gmra.mxu2 %vm508_vm0, %v495_v8  ;;  %1396 = vmatmul.msk.f32.gmra.mxu0 %vm508_vm0, %v488_v9 }
  0x4f   : > { %1404 = vmatmul.msk.f32.gmra.mxu2 %vm508_vm0, %v496_v10  ;;  %1397 = vmatmul.msk.f32.gmra.mxu0 %vm508_vm0, %v489_v11  ;;  %v655_v10 = vshrl.u32 %v654_v4, 7  ;;  %v625_v11 = vld [vmem:[%s1889_s18 + $0x18] sm:$0xff] }
  0x57   : > { %1405 = vmatmul.msk.f32.gmra.mxu2 %vm508_vm0, %v497_v12  ;;  %1398 = vmatmul.msk.f32.gmra.mxu0 %vm508_vm0, %v490_v13 }
  0x5f   : > { %1406 = vmatmul.msk.f32.gmra.mxu2 %vm508_vm0, %v498_v14  ;;  %1399 = vmatmul.msk.f32.gmra.mxu0 %vm508_vm0, %v491_v15  ;;  %v664_v14 = vstv %s1410_s13  ;;  %v660_v15 = vadd.s32 40, %v655_v10 }
  0x67   : > { %1407 = vmatmul.msk.f32.gmra.mxu2 %vm508_vm0, %v499_v16  ;;  %1400 = vmatmul.msk.f32.gmra.mxu0 %vm508_vm0, %v492_v17  ;;  %v624_v16 = vld [vmem:[%s1889_s18 + $0x10] sm:$0xff] }
  0x6f   : > { %1408 = vmatmul.msk.f32.gmra.mxu2 %vm508_vm0, %v500_v18 }
  0x77   : > { %1409 = vmatmul.msk.f32.gmra.mxu2 %vm508_vm0, %v501_v19 }
  0xb4   : > { %v1935_v23 = vpop.f32.mrf.mxu0 }
  0xb5   : > { %v575_v19 = vadd.f32 %v1944_v33, %v1935_v23  ;;  %v656_v23 = vadd.s32 8, %v655_v10 }
  0xba   : > { %v595_v20 = vpop.f32.mrf.mxu2 }
  0xbb   : > { %v596_v59 = vadd.f32 %v1944_v33, %v595_v20  ;;  %v623_v20 = vld [vmem:[%s1889_s18 + $0x8] sm:$0xff] }
  0xbc   : > { %v1937_v25 = vpop.f32.mrf.mxu0 }
  0xbd   : > { %v645_v2 = vmul.f32 %v629_v62, %v596_v59  ;;  %v578_v17 = vadd.f32 %v1944_v33, %v1937_v25  ;;  %v703_v62 = vld [vmem:[#allocation2 + $0x8] sm:$0xff] }
  0xbf   : > { %v639_v25 = vmul.f32 %v623_v20, %v578_v17 }
  0xc2   : > { %v598_v21 = vpop.f32.mrf.mxu2 }
  0xc3   : > { %v599_v56 = vadd.f32 %v1944_v33, %v598_v21  ;;  %v665_v21 = vadd.s32 %v664_v14, %v655_v10 }
  0xc4   : > { %v1939_v27 = vpop.f32.mrf.mxu0 }
  0xc5   : > { %v646_v0 = vmul.f32 %v630_v58, %v599_v56  ;;  %v581_v12 = vadd.f32 %v1944_v33, %v1939_v27  ;;  %v670_v27 = vadd.s32 %v664_v14, %v660_v15  ;;  %v706_v56 = vld [vmem:[#allocation2 + $0x38] sm:$0xff] }
  0xca   : > { %v601_v22 = vpop.f32.mrf.mxu2 }
  0xcb   : > { %v602_v52 = vadd.f32 %v1944_v33, %v601_v22  ;;  %v1562_v22 = vld [vmem:[%s455_s12] ss:$0 sm:$0xff] }
  0xcc   : > { %v583_v29 = vpop.f32.mrf.mxu0  ;;  %vm675_vm1 = vcmp.eq.s32.totalorder %v1562_v22, %v665_v21  ;;  %vm680_vm2 = vcmp.eq.s32.totalorder %v1562_v22, %v670_v27 }
  0xcd   : > { %v647_v60 = vmul.f32 %v631_v54, %v602_v52  ;;  %v584_v8 = vadd.f32 %v1944_v33, %v583_v29  ;;  %v661_v29 = vadd.s32 48, %v655_v10 }
  0xcf   : > { %v641_v18 = vmul.f32 %v625_v11, %v584_v8 }
  0xd2   : > { %v604_v24 = vpop.f32.mrf.mxu2 }
  0xd3   : > { %v605_v49 = vadd.f32 %v1944_v33, %v604_v24  ;;  %v640_v24 = vmul.f32 %v624_v16, %v581_v12 }
  0xd4   : > { %v586_v32 = vpop.f32.mrf.mxu0 }
  0xd5   : > { %v648_v57 = vmul.f32 %v632_v51, %v605_v49  ;;  %v587_v6 = vadd.f32 %v1944_v33, %v586_v32  ;;  %v671_v32 = vadd.s32 %v664_v14, %v661_v29  ;;  %v701_v51 = vld [vmem:[#allocation2 + $0x18] sm:$0xff] }
  0xd7   : > { %v642_v13 = vmul.f32 %v626_v7, %v587_v6  ;;  %vm681_vm4 = vcmp.eq.s32.totalorder %v1562_v22, %v671_v32 }
  0xda   : > { %v607_v26 = vpop.f32.mrf.mxu2 }
  0xdb   : > { %v608_v46 = vadd.f32 %v1944_v33, %v607_v26  ;;  %v622_v26 = vld [vmem:[%s1889_s18] sm:$0xff] }
  0xdc   : > { %v589_v39 = vpop.f32.mrf.mxu0 }
  0xdd   : > { %v649_v53 = vmul.f32 %v633_v48, %v608_v46  ;;  %v590_v1 = vadd.f32 %v1944_v33, %v589_v39  ;;  %v659_v39 = vadd.s32 32, %v655_v10 }
  0xdf   : > { %v643_v9 = vmul.f32 %v627_v5, %v590_v1 }
  0xe2   : > { %v610_v28 = vpop.f32.mrf.mxu2 }
  0xe3   : > { %v611_v43 = vadd.f32 %v1944_v33, %v610_v28  ;;  %v638_v28 = vmul.f32 %v622_v26, %v575_v19 }
  0xe4   : > { %v592_v55 = vpop.f32.mrf.mxu0 }
  0xe5   : > { %v650_v50 = vmul.f32 %v634_v45, %v611_v43  ;;  %v593_v61 = vadd.f32 %v1944_v33, %v592_v55  ;;  %v700_v45 = vld [vmem:[#allocation2] sm:$0xff] }
  0xe7   : > { %v644_v3 = vmul.f32 %v628_v63, %v593_v61 }
  0xea   : > { %v613_v30 = vpop.f32.mrf.mxu2 }
  0xeb   : > { %v614_v40 = vadd.f32 %v1944_v33, %v613_v30  ;;  %v1744_v30 = vmov 1.0  }
  0xed   : > { %v651_v47 = vmul.f32 %v635_v42, %v614_v40  ;;  %v669_v40 = vadd.s32 %v664_v14, %v659_v39 }
  0xef   : > { %vm679_vm8 = vcmp.eq.s32.totalorder %v1562_v22, %v669_v40 }
  0xf2   : > { %v616_v31 = vpop.f32.mrf.mxu2 }
  0xf3   : > { %v617_v36 = vadd.f32 %v1944_v33, %v616_v31  ;;  %v666_v31 = vadd.s32 %v664_v14, %v656_v23 }
  0xf5   : > { %v652_v44 = vmul.f32 %v636_v38, %v617_v36  ;;  %vm676_vm3 = vcmp.eq.s32.totalorder %v1562_v22, %v666_v31 }
  0xfa   : > { %v619_v34 = vpop.f32.mrf.mxu2 }
  0xfb   : > { %v620_v37 = vadd.f32 %v1944_v33, %v619_v34  ;;  %v657_v33 = vadd.s32 16, %v655_v10  ;;  %v662_v34 = vadd.s32 56, %v655_v10 }
  0xfd   : > { %v653_v41 = vmul.f32 %v637_v35, %v620_v37  ;;  %v667_v35 = vadd.s32 %v664_v14, %v657_v33  ;;  %v672_v36 = vadd.s32 %v664_v14, %v662_v34  ;;  %v658_v37 = vadd.s32 24, %v655_v10 }
  0xff   : > { %707 = vmatpush.msra.mxu1 %v653_v41  ;;  %1448 = vmatpush.msra.mxu3 %v653_v41  ;;  %vm677_vm5 = vcmp.eq.s32.totalorder %v1562_v22, %v667_v35  ;;  %vm682_vm6 = vcmp.eq.s32.totalorder %v1562_v22, %v672_v36  ;;  %v668_v38 = vadd.s32 %v664_v14, %v658_v37  ;;  %v699_v41 = vld [vmem:[#allocation2 + $0x30] sm:$0xff] }
 0x101   : > { %708 = vmatpush.msra.mxu1 %v652_v44  ;;  %1449 = vmatpush.msra.mxu3 %v652_v44  ;;  %vm678_vm7 = vcmp.eq.s32.totalorder %v1562_v22, %v668_v38  ;;  %v704_v44 = vld [vmem:[#allocation2 + $0x20] sm:$0xff] }
 0x103   : > { %709 = vmatpush.msra.mxu1 %v651_v47  ;;  %1450 = vmatpush.msra.mxu3 %v651_v47 }
 0x105   : > { %710 = vmatpush.msra.mxu1 %v650_v50  ;;  %1451 = vmatpush.msra.mxu3 %v650_v50  ;;  %v705_v50 = vld [vmem:[#allocation2 + $0x28] sm:$0xff] }
 0x107   : > { %711 = vmatpush.msra.mxu1 %v649_v53  ;;  %1452 = vmatpush.msra.mxu3 %v649_v53 }
 0x109   : > { %712 = vmatpush.msra.mxu1 %v648_v57  ;;  %1453 = vmatpush.msra.mxu3 %v648_v57  ;;  %v702_v57 = vld [vmem:[#allocation2 + $0x10] sm:$0xff] }
 0x10b   : > { %713 = vmatpush.msra.mxu1 %v647_v60  ;;  %1454 = vmatpush.msra.mxu3 %v647_v60 }
 0x10d   : > { %714 = vmatpush.msra.mxu1 %v646_v0  ;;  %1455 = vmatpush.msra.mxu3 %v646_v0 }
 0x10f   : > { %715 = vmatpush.msra.mxu1 %v645_v2  ;;  %1456 = vmatpush.msra.mxu3 %v645_v2 }
 0x111   : > { %716 = vmatpush.msra.mxu1 %v644_v3  ;;  %1457 = vmatpush.msra.mxu3 %v644_v3 }
 0x113   : > { %717 = vmatpush.msra.mxu1 %v643_v9  ;;  %1458 = vmatpush.msra.mxu3 %v643_v9 }
 0x115   : > { %718 = vmatpush.msra.mxu1 %v642_v13  ;;  %1459 = vmatpush.msra.mxu3 %v642_v13 }
 0x117   : > { %719 = vmatpush.msra.mxu1 %v641_v18  ;;  %1460 = vmatpush.msra.mxu3 %v641_v18 }
 0x119   : > { %720 = vmatpush.msra.mxu1 %v640_v24  ;;  %1461 = vmatpush.msra.mxu3 %v640_v24 }
 0x11b   : > { %721 = vmatpush.msra.mxu1 %v639_v25  ;;  %1462 = vmatpush.msra.mxu3 %v639_v25 }
 0x11d   : > { %722 = vmatpush.msra.mxu1 %v638_v28  ;;  %1463 = vmatpush.msra.mxu3 %v638_v28 }
 0x11e   : > { %1419 = vmatmul.msk.f32.vlgmr.msra.gmra.mxu1 %vm675_vm1, %v1744_v30  ;;  %1424 = vmatmul.msk.f32.vlgmr.msra.gmra.mxu3 %vm680_vm2, %v1744_v30 }
 0x126   : > { %1420 = vmatmul.msk.f32.gmra.mxu1 %vm676_vm3, %v1744_v30  ;;  %1425 = vmatmul.msk.f32.gmra.mxu3 %vm681_vm4, %v1744_v30 }
 0x12e   : > { %1421 = vmatmul.msk.f32.gmra.mxu1 %vm677_vm5, %v1744_v30  ;;  %1426 = vmatmul.msk.f32.gmra.mxu3 %vm682_vm6, %v1744_v30 }
 0x136   : > { %1422 = vmatmul.msk.f32.gmra.mxu1 %vm678_vm7, %v1744_v30 }
 0x13e   : > { %1423 = vmatmul.msk.f32.gmra.mxu1 %vm679_vm8, %v1744_v30 }
 0x19b   : > { %v724_v42 = vpop.f32.mrf.mxu1 }
 0x19c   : > { %v748_v43 = vadd.f32 %v724_v42, %v699_v41 }
 0x19e   : > { %756 = vst [vmem:[#allocation2 + $0x30] sm:$0xff] %v748_v43 }
 0x1a1   : > { %v739_v46 = vpop.f32.mrf.mxu3 }
 0x1a2   : > { %v753_v47 = vadd.f32 %v739_v46, %v704_v44 }
 0x1a3   : > { %v727_v48 = vpop.f32.mrf.mxu1 }
 0x1a4   : > { %v749_v49 = vadd.f32 %v727_v48, %v700_v45  ;;  %761 = vst [vmem:[#allocation2 + $0x20] sm:$0xff] %v753_v47 }
 0x1a6   : > { %757 = vst [vmem:[#allocation2] sm:$0xff] %v749_v49 }
 0x1a9   : > { %v742_v52 = vpop.f32.mrf.mxu3 }
 0x1aa   : > { %v754_v53 = vadd.f32 %v742_v52, %v705_v50 }
 0x1ab   : > { %v730_v54 = vpop.f32.mrf.mxu1 }
 0x1ac   : > { %v750_v55 = vadd.f32 %v730_v54, %v701_v51  ;;  %762 = vst [vmem:[#allocation2 + $0x28] sm:$0xff] %v754_v53 }
 0x1ae   : > { %758 = vst [vmem:[#allocation2 + $0x18] sm:$0xff] %v750_v55 }
 0x1b1   : > { %v745_v58 = vpop.f32.mrf.mxu3 }
 0x1b2   : > { %v755_v59 = vadd.f32 %v745_v58, %v706_v56 }
 0x1b3   : > { %v733_v60 = vpop.f32.mrf.mxu1 }
 0x1b4   : > { %v751_v61 = vadd.f32 %v733_v60, %v702_v57  ;;  %763 = vst [vmem:[#allocation2 + $0x38] sm:$0xff] %v755_v59 }
 0x1b6   : > { %759 = vst [vmem:[#allocation2 + $0x10] sm:$0xff] %v751_v61 }
 0x1ba   : > { %767 = sbr.rel (%p1427_p12) target bundleno = 952 (0x3b8), region = 80 }
 0x1bb   : > { %v736_v63 = vpop.f32.mrf.mxu1 }
 0x1bc   : > { %v752_v0 = vadd.f32 %v736_v63, %v703_v62 }
 0x1be   : > { %760 = vst [vmem:[#allocation2 + $0x8] sm:$0xff] %v752_v0 }
 0x1bf   : > { %v791_v1 = vld [vmem:[#allocation4 + $0x78] sm:$0xff]  ;;  %v790_v2 = vld [vmem:[#allocation4 + $0x70] sm:$0xff]  ;;  %v789_v3 = vld [vmem:[#allocation4 + $0x68] sm:$0xff] }
 0x1c0   : > { %796 = vmatpush.msra.mxu0 %v791_v1  ;;  %1464 = vmatpush.msra.mxu2 %v791_v1  ;;  %v788_v4 = vld [vmem:[#allocation4 + $0x60] sm:$0xff]  ;;  %v787_v5 = vld [vmem:[#allocation4 + $0x58] sm:$0xff]  ;;  %v786_v6 = vld [vmem:[#allocation4 + $0x50] sm:$0xff] }
 0x1c1   : > { %v785_v7 = vld [vmem:[#allocation4 + $0x48] sm:$0xff]  ;;  %v784_v8 = vld [vmem:[#allocation4 + $0x40] sm:$0xff]  ;;  %v783_v9 = vld [vmem:[#allocation4 + $0x38] sm:$0xff] }
 0x1c2   : > { %797 = vmatpush.msra.mxu0 %v790_v2  ;;  %1465 = vmatpush.msra.mxu2 %v790_v2  ;;  %v782_v10 = vld [vmem:[#allocation4 + $0x30] sm:$0xff]  ;;  %v781_v11 = vld [vmem:[#allocation4 + $0x28] sm:$0xff]  ;;  %v780_v12 = vld [vmem:[#allocation4 + $0x20] sm:$0xff] }
 0x1c3   : > { %v779_v13 = vld [vmem:[#allocation4 + $0x18] sm:$0xff]  ;;  %v778_v14 = vld [vmem:[#allocation4 + $0x10] sm:$0xff]  ;;  %v777_v15 = vld [vmem:[#allocation4 + $0x8] sm:$0xff] }
 0x1c4   : > { %798 = vmatpush.msra.mxu0 %v789_v3  ;;  %1466 = vmatpush.msra.mxu2 %v789_v3  ;;  %v776_v16 = vld [vmem:[#allocation4] sm:$0xff]  ;;  %v768_v17 = vld [vmem:[#allocation2 + $0x30] sm:$0xff]  ;;  %v770_v21 = vld [vmem:[#allocation2 + $0x18] sm:$0xff] }
 0x1c5   : > { %v772_v18 = vld [vmem:[#allocation2 + $0x8] sm:$0xff]  ;;  %v769_v19 = vld [vmem:[#allocation2] sm:$0xff]  ;;  %v771_v24 = vld [vmem:[#allocation2 + $0x10] sm:$0xff] }
 0x1c6   : > { %799 = vmatpush.msra.mxu0 %v788_v4  ;;  %1467 = vmatpush.msra.mxu2 %v788_v4  ;;  %v773_v20 = vld [vmem:[#allocation2 + $0x20] sm:$0xff]  ;;  %v774_v22 = vld [vmem:[#allocation2 + $0x28] sm:$0xff]  ;;  %v775_v26 = vld [vmem:[#allocation2 + $0x38] sm:$0xff] }
 0x1c7   : > { %v1012_v27 = vld [vmem:[#allocation6 + $0x78] sm:$0xff]  ;;  %v1011_v25 = vld [vmem:[#allocation6 + $0x70] sm:$0xff]  ;;  %v1010_v28 = vld [vmem:[#allocation6 + $0x68] sm:$0xff] }
 0x1c8   : > { %800 = vmatpush.msra.mxu0 %v787_v5  ;;  %1468 = vmatpush.msra.mxu2 %v787_v5  ;;  %v1009_v23 = vld [vmem:[#allocation6 + $0x60] sm:$0xff]  ;;  %v1008_v29 = vld [vmem:[#allocation6 + $0x58] sm:$0xff]  ;;  %v1007_v30 = vld [vmem:[#allocation6 + $0x50] sm:$0xff] }
 0x1c9   : > { %1017 = vmatpush.msra.mxu1 %v1012_v27  ;;  %1480 = vmatpush.msra.mxu3 %v1012_v27  ;;  %v1006_v31 = vld [vmem:[#allocation6 + $0x48] sm:$0xff]  ;;  %v1005_v32 = vld [vmem:[#allocation6 + $0x40] sm:$0xff]  ;;  %v1004_v33 = vld [vmem:[#allocation6 + $0x38] sm:$0xff] }
 0x1ca   : > { %801 = vmatpush.msra.mxu0 %v786_v6  ;;  %1469 = vmatpush.msra.mxu2 %v786_v6  ;;  %v1003_v34 = vld [vmem:[#allocation6 + $0x30] sm:$0xff]  ;;  %v1002_v35 = vld [vmem:[#allocation6 + $0x28] sm:$0xff]  ;;  %v1001_v36 = vld [vmem:[#allocation6 + $0x20] sm:$0xff] }
 0x1cb   : > { %1018 = vmatpush.msra.mxu1 %v1011_v25  ;;  %1481 = vmatpush.msra.mxu3 %v1011_v25  ;;  %v1000_v37 = vld [vmem:[#allocation6 + $0x18] sm:$0xff]  ;;  %v999_v38 = vld [vmem:[#allocation6 + $0x10] sm:$0xff]  ;;  %v998_v40 = vld [vmem:[#allocation6 + $0x8] sm:$0xff] }
 0x1cc   : > { %802 = vmatpush.msra.mxu0 %v785_v7  ;;  %1470 = vmatpush.msra.mxu2 %v785_v7  ;;  %v1991_v39 = vld [vmem:[%s2245_s6] ss:$0 sm:$0xff]  ;;  %v997_v41 = vld [vmem:[#allocation6] sm:$0xff] }
 0x1cd   : > { %1019 = vmatpush.msra.mxu1 %v1010_v28  ;;  %1482 = vmatpush.msra.mxu3 %v1010_v28 }
 0x1ce   : > { %803 = vmatpush.msra.mxu0 %v784_v8  ;;  %1471 = vmatpush.msra.mxu2 %v784_v8 }
 0x1cf   : > { %1020 = vmatpush.msra.mxu1 %v1009_v23  ;;  %1483 = vmatpush.msra.mxu3 %v1009_v23 }
 0x1d0   : > { %804 = vmatpush.msra.mxu0 %v783_v9  ;;  %1472 = vmatpush.msra.mxu2 %v783_v9 }
 0x1d1   : > { %1021 = vmatpush.msra.mxu1 %v1008_v29  ;;  %1484 = vmatpush.msra.mxu3 %v1008_v29 }
 0x1d2   : > { %805 = vmatpush.msra.mxu0 %v782_v10  ;;  %1473 = vmatpush.msra.mxu2 %v782_v10 }
 0x1d3   : > { %1022 = vmatpush.msra.mxu1 %v1007_v30  ;;  %1485 = vmatpush.msra.mxu3 %v1007_v30 }
 0x1d4   : > { %806 = vmatpush.msra.mxu0 %v781_v11  ;;  %1474 = vmatpush.msra.mxu2 %v781_v11 }
 0x1d5   : > { %1023 = vmatpush.msra.mxu1 %v1006_v31  ;;  %1486 = vmatpush.msra.mxu3 %v1006_v31 }
 0x1d6   : > { %807 = vmatpush.msra.mxu0 %v780_v12  ;;  %1475 = vmatpush.msra.mxu2 %v780_v12 }
 0x1d7   : > { %1024 = vmatpush.msra.mxu1 %v1005_v32  ;;  %1487 = vmatpush.msra.mxu3 %v1005_v32 }
 0x1d8   : > { %808 = vmatpush.msra.mxu0 %v779_v13  ;;  %1476 = vmatpush.msra.mxu2 %v779_v13 }
 0x1d9   : > { %1025 = vmatpush.msra.mxu1 %v1004_v33  ;;  %1488 = vmatpush.msra.mxu3 %v1004_v33 }
 0x1da   : > { %809 = vmatpush.msra.mxu0 %v778_v14  ;;  %1477 = vmatpush.msra.mxu2 %v778_v14 }
 0x1db   : > { %1026 = vmatpush.msra.mxu1 %v1003_v34  ;;  %1489 = vmatpush.msra.mxu3 %v1003_v34 }
 0x1dc   : > { %810 = vmatpush.msra.mxu0 %v777_v15  ;;  %1478 = vmatpush.msra.mxu2 %v777_v15 }
 0x1dd   : > { %1027 = vmatpush.msra.mxu1 %v1002_v35  ;;  %1490 = vmatpush.msra.mxu3 %v1002_v35 }
 0x1de   : > { %811 = vmatpush.msra.mxu0 %v776_v16  ;;  %1479 = vmatpush.msra.mxu2 %v776_v16 }
 0x1df   : > { %812 = vmatmul.f32.vlgmr.msra.gmra.mxu0 %v768_v17  ;;  %824 = vmatmul.f32.vlgmr.msra.gmra.mxu2 %v772_v18 }
 0x1e0   : > { %1028 = vmatpush.msra.mxu1 %v1001_v36  ;;  %1491 = vmatpush.msra.mxu3 %v1001_v36 }
 0x1e2   : > { %1029 = vmatpush.msra.mxu1 %v1000_v37  ;;  %1492 = vmatpush.msra.mxu3 %v1000_v37 }
 0x1e4   : > { %1030 = vmatpush.msra.mxu1 %v999_v38  ;;  %1493 = vmatpush.msra.mxu3 %v999_v38 }
 0x1e6   : > { %1031 = vmatpush.msra.mxu1 %v998_v40  ;;  %1494 = vmatpush.msra.mxu3 %v998_v40 }
 0x1e7   : > { %815 = vmatmul.f32.gmra.mxu0 %v769_v19  ;;  %827 = vmatmul.f32.gmra.mxu2 %v773_v20 }
 0x1e8   : > { %1032 = vmatpush.msra.mxu1 %v997_v41  ;;  %1495 = vmatpush.msra.mxu3 %v997_v41 }
 0x1ef   : > { %818 = vmatmul.f32.gmra.mxu0 %v770_v21  ;;  %830 = vmatmul.f32.gmra.mxu2 %v774_v22 }
 0x1f7   : > { %821 = vmatmul.f32.gmra.mxu0 %v771_v24  ;;  %833 = vmatmul.f32.gmra.mxu2 %v775_v26 }
 0x25c   : > { %v813_v42 = vpop.f32.mrf.mxu0 }
 0x25d   : > { %v1994_v43 = vadd.f32 %v1991_v39, %v813_v42 }
 0x25f   : > { %v1428_v44 = vmul.f32 -1.442695, %v1994_v43 }
 0x261   : > { %1567 = vpow2.f32 %v1428_v44 }
 0x262   : > { %v825_v45 = vpop.f32.mrf.mxu2 }
 0x263   : > { %v1998_v46 = vadd.f32 %v1991_v39, %v825_v45 }
 0x264   : > { %v816_v47 = vpop.f32.mrf.mxu0 }
 0x265   : > { %v1432_v48 = vmul.f32 -1.442695, %v1998_v46  ;;  %v2002_v49 = vadd.f32 %v1991_v39, %v816_v47 }
 0x267   : > { %v1568_v50 = vpop.eup %1567  ;;  %1569 = vpow2.f32 %v1432_v48  ;;  %v1429_v51 = vmul.f32 -1.442695, %v2002_v49 }
 0x268   : > { %v861_v52 = vadd.f32 1.0, %v1568_v50 }
 0x269   : > { %1571 = vpow2.f32 %v1429_v51 }
 0x26a   : > { %1573 = vrcp.f32 %v861_v52  ;;  %v828_v53 = vpop.f32.mrf.mxu2  ;;  %v878_v2 = vand.u32 2147483647, %v861_v52  ;;  %v880_v3 = vand.u32 2147483648, %v861_v52  ;;  %vm874_vm10 = vweird.f32 %v861_v52 }
 0x26b   : > { %v2006_v54 = vadd.f32 %v1991_v39, %v828_v53 }
 0x26c   : > { %v819_v55 = vpop.f32.mrf.mxu0  ;;  %vm2025_vm11 = vcmp.eq.f32.partialorder %v878_v2, 8.507059e+37  ;;  %v881_v14 = vor.u32 1.1754944e-38, %v880_v3 }
 0x26d   : > { %v1570_v56 = vpop.eup %1569  ;;  %v1433_v57 = vmul.f32 -1.442695, %v2006_v54  ;;  %v2010_v58 = vadd.f32 %v1991_v39, %v819_v55 }
 0x26e   : > { %v865_v59 = vadd.f32 1.0, %v1570_v56 }
 0x26f   : > { %v1572_v60 = vpop.eup %1571  ;;  %1575 = vpow2.f32 %v1433_v57  ;;  %v1430_v61 = vmul.f32 -1.442695, %v2010_v58 }
 0x270   : > { %v1574_v62 = vpop.eup %1573  ;;  %1577 = vrcp.f32 %v865_v59  ;;  %v2013_v63 = vadd.f32 1.0, %v1572_v60  ;;  %v938_v21 = vand.u32 2147483647, %v865_v59  ;;  %v940_v22 = vand.u32 2147483648, %v865_v59 }
 0x271   : > { %1579 = vpow2.f32 %v1430_v61  ;;  %v870_v0 = vmul.f32 %v1574_v62, %v861_v52  ;;  %vm875_vm9 = vweird.f32 %v1574_v62  ;;  %vm934_vm14 = vweird.f32 %v865_v59 }
 0x272   : > { %1581 = vrcp.f32 %v2013_v63  ;;  %v831_v1 = vpop.f32.mrf.mxu2  ;;  %vm876_vm12 = vmor %vm874_vm10, %vm875_vm9  ;;  %v893_v23 = vand.u32 2147483647, %v2013_v63  ;;  %vm2042_vm15 = vcmp.eq.f32.partialorder %v938_v21, 8.507059e+37  ;;  %v895_v34 = vand.u32 2147483648, %v2013_v63 }
 0x273   : > { %v2017_v4 = vadd.f32 %v1991_v39, %v831_v1  ;;  %v871_v5 = vsub.f32 1.0, %v870_v0  ;;  %v941_v41 = vor.u32 1.1754944e-38, %v940_v22  ;;  %vm889_vm2 = vweird.f32 %v2013_v63 }
 0x274   : > { %v822_v6 = vpop.f32.mrf.mxu0  ;;  %vm2052_vm3 = vcmp.eq.f32.partialorder %v893_v23, 8.507059e+37  ;;  %v896_v52 = vor.u32 1.1754944e-38, %v895_v34 }
 0x275   : > { %v1576_v7 = vpop.eup %1575  ;;  %v1434_v8 = vmul.f32 -1.442695, %v2017_v4  ;;  %v2021_v9 = vadd.f32 %v1991_v39, %v822_v6  ;;  %v872_v10 = vmul.f32 %v1574_v62, %v871_v5 }
 0x276   : > { %v1578_v11 = vpop.eup %1577  ;;  %v2023_v12 = vadd.f32 1.0, %v1576_v7 }
 0x277   : > { %v1580_v15 = vpop.eup %1579  ;;  %1583 = vpow2.f32 %v1434_v8  ;;  %v1431_v16 = vmul.f32 -1.442695, %v2021_v9  ;;  %v873_v17 = vadd.f32 %v1574_v62, %v872_v10  ;;  %v930_v18 = vmul.f32 %v1578_v11, %v865_v59 }
 0x278   : > { %v1582_v19 = vpop.eup %1581  ;;  %1585 = vrcp.f32 %v2023_v12  ;;  %v2031_v20 = vadd.f32 1.0, %v1580_v15  ;;  %vm935_vm13 = vweird.f32 %v1578_v11  ;;  %v953_v60 = vand.u32 2147483647, %v2023_v12 }
 0x279   : > { %1587 = vpow2.f32 %v1431_v16  ;;  %v877_v24 = vsel %vm876_vm12, %v1574_v62, %v873_v17  ;;  %v931_v26 = vsub.f32 1.0, %v930_v18  ;;  %v885_v27 = vmul.f32 %v1582_v19, %v2013_v63  ;;  %vm936_vm1 = vmor %vm934_vm14, %vm935_vm13 }
 0x27a   : > { %1589 = vrcp.f32 %v2031_v20  ;;  %v834_v25 = vpop.f32.mrf.mxu2  ;;  %v882_v28 = vsel %vm2025_vm11, %v881_v14, %v877_v24  ;;  %vm890_vm0 = vweird.f32 %v1582_v19  ;;  %v955_v61 = vand.u32 2147483648, %v2023_v12 }
 0x27b   : > { %v2039_v29 = vadd.f32 %v1991_v39, %v834_v25  ;;  %v989_v30 = vmul.f32 %v882_v28, %v1994_v43  ;;  %v932_v31 = vmul.f32 %v1578_v11, %v931_v26  ;;  %v886_v32 = vsub.f32 1.0, %v885_v27  ;;  %vm891_vm4 = vmor %vm889_vm2, %vm890_vm0 }
 0x27c   : > { %v910_v1 = vand.u32 2147483648, %v2031_v20  ;;  %vm949_vm6 = vweird.f32 %v2023_v12  ;;  %vm954_vm9 = vcmp.eq.f32.partialorder %v953_v60, 8.507059e+37  ;;  %v956_v8 = vor.u32 1.1754944e-38, %v955_v61 }
 0x27d   : > { %v1584_v35 = vpop.eup %1583  ;;  %v1435_v36 = vmul.f32 -1.442695, %v2039_v29  ;;  %1033 = vmatmul.f32.vlgmr.msra.gmra.mxu1 %v989_v30  ;;  %v933_v37 = vadd.f32 %v1578_v11, %v932_v31  ;;  %v887_v38 = vmul.f32 %v1582_v19, %v886_v32  ;;  %vm904_vm10 = vweird.f32 %v2031_v20 }
 0x27e   : > { %v1586_v39 = vpop.eup %1585  ;;  %v2048_v40 = vadd.f32 1.0, %v1584_v35  ;;  %v911_v15 = vor.u32 1.1754944e-38, %v910_v1 }
 0x27f   : > { %v1588_v43 = vpop.eup %1587  ;;  %1591 = vpow2.f32 %v1435_v36  ;;  %v937_v44 = vsel %vm936_vm1, %v1578_v11, %v933_v37  ;;  %v888_v45 = vadd.f32 %v1582_v19, %v887_v38  ;;  %v945_v47 = vmul.f32 %v1586_v39, %v2023_v12 }
 0x280   : > { %v1590_v48 = vpop.eup %1589  ;;  %1593 = vrcp.f32 %v2048_v40  ;;  %v2058_v50 = vadd.f32 1.0, %v1588_v43  ;;  %v942_v51 = vsel %vm2042_vm15, %v941_v41, %v937_v44  ;;  %vm950_vm5 = vweird.f32 %v1586_v39 }
 0x281   : > { %v993_v53 = vmul.f32 %v942_v51, %v1998_v46  ;;  %v892_v55 = vsel %vm891_vm4, %v1582_v19, %v888_v45  ;;  %v946_v56 = vsub.f32 1.0, %v945_v47  ;;  %v900_v57 = vmul.f32 %v1590_v48, %v2031_v20  ;;  %vm951_vm8 = vmor %vm949_vm6, %vm950_vm5 }
 0x282   : > { %1595 = vrcp.f32 %v2058_v50  ;;  %v897_v59 = vsel %vm2052_vm3, %v896_v52, %v892_v55  ;;  %v908_v46 = vand.u32 2147483647, %v2031_v20  ;;  %vm905_vm7 = vweird.f32 %v1590_v48 }
 0x283   : > { %1045 = vmatmul.f32.vlgmr.msra.gmra.mxu3 %v993_v53  ;;  %v990_v62 = vmul.f32 %v897_v59, %v2002_v49  ;;  %v947_v63 = vmul.f32 %v1586_v39, %v946_v56  ;;  %v901_v0 = vsub.f32 1.0, %v900_v57  ;;  %vm906_vm11 = vmor %vm904_vm10, %vm905_vm7  ;;  %v968_v21 = vand.u32 2147483647, %v2048_v40 }
 0x284   : > { %vm909_vm12 = vcmp.eq.f32.partialorder %v908_v46, 8.507059e+37  ;;  %v970_v22 = vand.u32 2147483648, %v2048_v40  ;;  %vm964_vm14 = vweird.f32 %v2048_v40  ;;  %v925_v27 = vand.u32 2147483648, %v2058_v50 }
 0x285   : > { %v1592_v2 = vpop.eup %1591  ;;  %1036 = vmatmul.f32.gmra.mxu1 %v990_v62  ;;  %v948_v3 = vadd.f32 %v1586_v39, %v947_v63  ;;  %v902_v5 = vmul.f32 %v1590_v48, %v901_v0  ;;  %v923_v28 = vand.u32 2147483647, %v2058_v50  ;;  %vm919_vm1 = vweird.f32 %v2058_v50 }
 0x286   : > { %v1594_v6 = vpop.eup %1593  ;;  %v868_v7 = vadd.f32 1.0, %v1592_v2  ;;  %v971_v30 = vor.u32 1.1754944e-38, %v970_v22  ;;  %vm969_vm2 = vcmp.eq.f32.partialorder %v968_v21, 8.507059e+37  ;;  %v926_v34 = vor.u32 1.1754944e-38, %v925_v27  ;;  %v2126_v27 = vld [vmem:[%s2248_s9] ss:$0 sm:$0xff] }
 0x287   : > { %v952_v49 = vsel %vm951_vm8, %v1586_v39, %v948_v3  ;;  %v903_v10 = vadd.f32 %v1590_v48, %v902_v5  ;;  %v960_v11 = vmul.f32 %v1594_v6, %v2048_v40  ;;  %vm965_vm13 = vweird.f32 %v1594_v6 }
 0x288   : > { %v1596_v13 = vpop.eup %1595  ;;  %1597 = vrcp.f32 %v868_v7  ;;  %v957_v14 = vsel %vm954_vm9, %v956_v8, %v952_v49  ;;  %vm966_vm0 = vmor %vm964_vm14, %vm965_vm13  ;;  %vm924_vm4 = vcmp.eq.f32.partialorder %v923_v28, 8.507059e+37  ;;  %v985_v39 = vand.u32 2147483648, %v868_v7 }
 0x289   : > { %v994_v12 = vmul.f32 %v957_v14, %v2006_v54  ;;  %v907_v16 = vsel %vm906_vm11, %v1590_v48, %v903_v10  ;;  %v961_v17 = vsub.f32 1.0, %v960_v11  ;;  %v915_v18 = vmul.f32 %v1596_v13, %v2058_v50  ;;  %v2091_v48 = vld [vmem:[%s2247_s8] ss:$0 sm:$0xff] }
 0x28a   : > { %v912_v19 = vsel %vm909_vm12, %v911_v15, %v907_v16  ;;  %vm920_vm15 = vweird.f32 %v1596_v13  ;;  %v983_v42 = vand.u32 2147483647, %v868_v7  ;;  %vm979_vm6 = vweird.f32 %v868_v7 }
 0x28b   : > { %1048 = vmatmul.f32.gmra.mxu3 %v994_v12  ;;  %v991_v20 = vmul.f32 %v912_v19, %v2010_v58  ;;  %v962_v24 = vmul.f32 %v1594_v6, %v961_v17  ;;  %v916_v26 = vsub.f32 1.0, %v915_v18  ;;  %vm921_vm3 = vmor %vm919_vm1, %vm920_vm15  ;;  %v986_v44 = vor.u32 1.1754944e-38, %v985_v39 }
 0x28c   : > { %vm984_vm8 = vcmp.eq.f32.partialorder %v983_v42, 8.507059e+37 }
 0x28d   : > { %1039 = vmatmul.f32.gmra.mxu1 %v991_v20  ;;  %v963_v54 = vadd.f32 %v1594_v6, %v962_v24  ;;  %v917_v25 = vmul.f32 %v1596_v13, %v916_v26 }
 0x28e   : > { %v1598_v23 = vpop.eup %1597 }
 0x28f   : > { %v967_v31 = vsel %vm966_vm0, %v1594_v6, %v963_v54  ;;  %v918_v58 = vadd.f32 %v1596_v13, %v917_v25  ;;  %v975_v32 = vmul.f32 %v1598_v23, %v868_v7  ;;  %vm980_vm5 = vweird.f32 %v1598_v23 }
 0x290   : > { %v972_v33 = vsel %vm969_vm2, %v971_v30, %v967_v31  ;;  %vm981_vm7 = vmor %vm979_vm6, %vm980_vm5 }
 0x291   : > { %v995_v35 = vmul.f32 %v972_v33, %v2017_v4  ;;  %v922_v36 = vsel %vm921_vm3, %v1596_v13, %v918_v58  ;;  %v976_v37 = vsub.f32 1.0, %v975_v32 }
 0x292   : > { %v927_v38 = vsel %vm924_vm4, %v926_v34, %v922_v36 }
 0x293   : > { %1051 = vmatmul.f32.gmra.mxu3 %v995_v35  ;;  %v992_v40 = vmul.f32 %v927_v38, %v2021_v9  ;;  %v977_v41 = vmul.f32 %v1598_v23, %v976_v37 }
 0x295   : > { %1042 = vmatmul.f32.gmra.mxu1 %v992_v40  ;;  %v978_v43 = vadd.f32 %v1598_v23, %v977_v41 }
 0x297   : > { %v982_v45 = vsel %vm981_vm7, %v1598_v23, %v978_v43 }
 0x298   : > { %v987_v47 = vsel %vm984_vm8, %v986_v44, %v982_v45 }
 0x299   : > { %v996_v4 = vmul.f32 %v987_v47, %v2039_v29 }
 0x29b   : > { %1054 = vmatmul.f32.gmra.mxu3 %v996_v4 }
 0x2fa   : > { %v1034_v9 = vpop.f32.mrf.mxu1 }
 0x2fb   : > { %v1035_v50 = vadd.f32 %v2091_v48, %v1034_v9 }
 0x2fd   : > { %v1436_v51 = vmul.f32 -1.442695, %v1035_v50 }
 0x2ff   : > { %1599 = vpow2.f32 %v1436_v51 }
 0x302   : > { %v1037_v52 = vpop.f32.mrf.mxu1 }
 0x303   : > { %v2095_v53 = vadd.f32 %v2091_v48, %v1037_v52 }
 0x305   : > { %v1600_v55 = vpop.eup %1599  ;;  %v1437_v56 = vmul.f32 -1.442695, %v2095_v53 }
 0x306   : > { %v1082_v57 = vadd.f32 1.0, %v1600_v55  ;;  %v1046_v29 = vpop.f32.mrf.mxu3 }
 0x307   : > { %1601 = vpow2.f32 %v1437_v56  ;;  %v2099_v59 = vadd.f32 %v2091_v48, %v1046_v29 }
 0x308   : > { %1603 = vrcp.f32 %v1082_v57  ;;  %v1101_v14 = vand.u32 2147483648, %v1082_v57  ;;  %v1099_v15 = vand.u32 2147483647, %v1082_v57  ;;  %vm1095_vm10 = vweird.f32 %v1082_v57 }
 0x309   : > { %v1440_v60 = vmul.f32 -1.442695, %v2099_v59 }
 0x30a   : > { %v1040_v61 = vpop.f32.mrf.mxu1  ;;  %v1102_v24 = vor.u32 1.1754944e-38, %v1101_v14  ;;  %vm1100_vm12 = vcmp.eq.f32.partialorder %v1099_v15, 8.507059e+37 }
 0x30b   : > { %1605 = vpow2.f32 %v1440_v60  ;;  %v2103_v62 = vadd.f32 %v2091_v48, %v1040_v61 }
 0x30d   : > { %v1602_v63 = vpop.eup %1601  ;;  %v1438_v0 = vmul.f32 -1.442695, %v2103_v62 }
 0x30e   : > { %v1604_v46 = vpop.eup %1603  ;;  %v1083_v1 = vadd.f32 1.0, %v1602_v63  ;;  %v1049_v2 = vpop.f32.mrf.mxu3 }
 0x30f   : > { %1607 = vpow2.f32 %v1438_v0  ;;  %v2107_v3 = vadd.f32 %v2091_v48, %v1049_v2  ;;  %v1091_v5 = vmul.f32 %v1604_v46, %v1082_v57  ;;  %vm1096_vm9 = vweird.f32 %v1604_v46 }
 0x310   : > { %1609 = vrcp.f32 %v1083_v1  ;;  %vm1097_vm11 = vmor %vm1095_vm10, %vm1096_vm9  ;;  %v1114_v28 = vand.u32 2147483647, %v1083_v1  ;;  %v1116_v58 = vand.u32 2147483648, %v1083_v1  ;;  %vm1110_vm14 = vweird.f32 %v1083_v1 }
 0x311   : > { %v1606_v6 = vpop.eup %1605  ;;  %v1441_v7 = vmul.f32 -1.442695, %v2107_v3  ;;  %v1092_v8 = vsub.f32 1.0, %v1091_v5 }
 0x312   : > { %v2110_v49 = vadd.f32 1.0, %v1606_v6  ;;  %v1043_v10 = vpop.f32.mrf.mxu1  ;;  %vm1115_vm15 = vcmp.eq.f32.partialorder %v1114_v28, 8.507059e+37  ;;  %v1117_v41 = vor.u32 1.1754944e-38, %v1116_v58 }
 0x313   : > { %1611 = vpow2.f32 %v1441_v7  ;;  %v2113_v11 = vadd.f32 %v2091_v48, %v1043_v10  ;;  %v1093_v13 = vmul.f32 %v1604_v46, %v1092_v8 }
 0x314   : > { %1613 = vrcp.f32 %v2110_v49  ;;  %v1159_v44 = vand.u32 2147483647, %v2110_v49  ;;  %v1161_v45 = vand.u32 2147483648, %v2110_v49  ;;  %vm1155_vm2 = vweird.f32 %v2110_v49 }
 0x315   : > { %v1608_v12 = vpop.eup %1607  ;;  %v1439_v16 = vmul.f32 -1.442695, %v2113_v11  ;;  %v1094_v17 = vadd.f32 %v1604_v46, %v1093_v13 }
 0x316   : > { %v1610_v18 = vpop.eup %1609  ;;  %v2117_v19 = vadd.f32 1.0, %v1608_v12  ;;  %v1052_v21 = vpop.f32.mrf.mxu3  ;;  %vm1160_vm3 = vcmp.eq.f32.partialorder %v1159_v44, 8.507059e+37  ;;  %v1162_v63 = vor.u32 1.1754944e-38, %v1161_v45 }
 0x317   : > { %v1106_v22 = vmul.f32 %v1610_v18, %v1083_v1  ;;  %1615 = vpow2.f32 %v1439_v16  ;;  %v2120_v20 = vadd.f32 %v2091_v48, %v1052_v21  ;;  %v1098_v26 = vsel %vm1097_vm11, %v1604_v46, %v1094_v17 }
 0x318   : > { %1617 = vrcp.f32 %v2117_v19  ;;  %v1103_v30 = vsel %vm1100_vm12, %v1102_v24, %v1098_v26  ;;  %vm1111_vm13 = vweird.f32 %v1610_v18  ;;  %vm1125_vm5 = vweird.f32 %v2117_v19 }
 0x319   : > { %v1612_v54 = vpop.eup %1611  ;;  %v1107_v25 = vsub.f32 1.0, %v1106_v22  ;;  %v1442_v23 = vmul.f32 -1.442695, %v2120_v20  ;;  %v1210_v33 = vmul.f32 %v1103_v30, %v1035_v50  ;;  %vm1112_vm0 = vmor %vm1110_vm14, %vm1111_vm13 }
 0x31a   : > { %v1614_v31 = vpop.eup %1613  ;;  %v2129_v32 = vadd.f32 1.0, %v1612_v54 }
 0x31b   : > { %v1108_v34 = vmul.f32 %v1610_v18, %v1107_v25  ;;  %1619 = vpow2.f32 %v1442_v23  ;;  %v1151_v35 = vmul.f32 %v1614_v31, %v2110_v49  ;;  %v1222_v38 = vmul.f32 %v2126_v27, %v1210_v33 }
 0x31c   : > { %1621 = vrcp.f32 %v2129_v32  ;;  %vm1156_vm1 = vweird.f32 %v1614_v31  ;;  %v1174_v0 = vand.u32 2147483647, %v2129_v32  ;;  %v1176_v7 = vand.u32 2147483648, %v2129_v32 }
 0x31d   : > { %v1616_v36 = vpop.eup %1615  ;;  %v1109_v37 = vadd.f32 %v1610_v18, %v1108_v34  ;;  %v1152_v39 = vsub.f32 1.0, %v1151_v35  ;;  %1230 = vadd.xlane.f32.xlu0 %v1222_v38  ;;  %vm1157_vm4 = vmor %vm1155_vm2, %vm1156_vm1  ;;  %v1131_v49 = vand.u32 2147483648, %v2117_v19  ;;  %vm1170_vm8 = vweird.f32 %v2129_v32 }
 0x31e   : > { %v2134_v40 = vpop.eup %1617  ;;  %v2136_v42 = vadd.f32 1.0, %v1616_v36  ;;  %v1055_v43 = vpop.f32.mrf.mxu3  ;;  %vm2164_vm9 = vcmp.eq.f32.partialorder %v1174_v0, 8.507059e+37  ;;  %v1177_v54 = vor.u32 1.1754944e-38, %v1176_v7 }
 0x31f   : > { %v1113_v47 = vsel %vm1112_vm0, %v1610_v18, %v1109_v37  ;;  %v2141_v4 = vadd.f32 %v2091_v48, %v1055_v43  ;;  %v1153_v9 = vmul.f32 %v1614_v31, %v1152_v39  ;;  %v1121_v50 = vmul.f32 %v2134_v40, %v2117_v19 }
 0x320   : > { %v1118_v51 = vsel %vm1115_vm15, %v1117_v41, %v1113_v47  ;;  %1623 = vrcp.f32 %v2136_v42  ;;  %vm1126_vm6 = vweird.f32 %v2134_v40  ;;  %v1144_v22 = vand.u32 2147483647, %v2136_v42 }
 0x321   : > { %v1620_v52 = vpop.eup %1619  ;;  %v1211_v55 = vmul.f32 %v1118_v51, %v2095_v53  ;;  %v1443_v56 = vmul.f32 -1.442695, %v2141_v4  ;;  %v1154_v57 = vadd.f32 %v1614_v31, %v1153_v9  ;;  %v1122_v48 = vsub.f32 1.0, %v1121_v50  ;;  %vm2179_vm11 = vmor %vm1125_vm5, %vm1126_vm6 }
 0x322   : > { %v1622_v29 = vpop.eup %1621  ;;  %v2148_v60 = vadd.f32 1.0, %v1620_v52  ;;  %v1129_v53 = vand.u32 2147483647, %v2117_v19  ;;  %v1146_v25 = vand.u32 2147483648, %v2136_v42  ;;  %vm1140_vm14 = vweird.f32 %v2136_v42 }
 0x323   : > { %v1166_v61 = vmul.f32 %v1622_v29, %v2129_v32  ;;  %1625 = vpow2.f32 %v1443_v56  ;;  %v1223_v1 = vmul.f32 %v2126_v27, %v1211_v55  ;;  %v1158_v2 = vsel %vm1157_vm4, %v1614_v31, %v1154_v57 }
 0x324   : > { %1627 = vrcp.f32 %v2148_v60  ;;  %v1123_v5 = vmul.f32 %v2134_v40, %v1122_v48  ;;  %v1163_v8 = vsel %vm1160_vm3, %v1162_v63, %v1158_v2  ;;  %vm1171_vm7 = vweird.f32 %v1622_v29 }
 0x325   : > { %v1167_v46 = vsub.f32 1.0, %v1166_v61  ;;  %1232 = vadd.xlane.f32.xlu0 %v1223_v1  ;;  %v1214_v14 = vmul.f32 %v1163_v8, %v2099_v59  ;;  %vm2169_vm10 = vcmp.eq.f32.partialorder %v1129_v53, 8.507059e+37  ;;  %vm1172_vm12 = vmor %vm1170_vm8, %vm1171_vm7  ;;  %v1132_v32 = vor.u32 1.1754944e-38, %v1131_v49  ;;  %v1566_v1 = vld [vmem:[#allocation3] ss:$0 sm:$0xff] }
 0x326   : > { %v1624_v6 = vpop.eup %1623  ;;  %v1124_v12 = vadd.f32 %v2134_v40, %v1123_v5  ;;  %vm1145_vm15 = vcmp.eq.f32.partialorder %v1144_v22, 8.507059e+37  ;;  %v1147_v36 = vor.u32 1.1754944e-38, %v1146_v25  ;;  %v1189_v37 = vand.u32 2147483647, %v2148_v60 }
 0x327   : > { %v1168_v10 = vmul.f32 %v1622_v29, %v1167_v46  ;;  %v1136_v13 = vmul.f32 %v1624_v6, %v2136_v42  ;;  %v1226_v24 = vmul.f32 %v2126_v27, %v1214_v14  ;;  %vm1141_vm13 = vweird.f32 %v1624_v6 }
 0x328   : > { %v1128_v19 = vsel %vm2179_vm11, %v2134_v40, %v1124_v12  ;;  %vm1142_vm0 = vmor %vm1140_vm14, %vm1141_vm13  ;;  %v1191_v38 = vand.u32 2147483648, %v2148_v60  ;;  %vm1185_vm2 = vweird.f32 %v2148_v60  ;;  %vm1190_vm4 = vcmp.eq.f32.partialorder %v1189_v37, 8.507059e+37 }
 0x329   : > { %v1626_v17 = vpop.eup %1625  ;;  %v1169_v18 = vadd.f32 %v1622_v29, %v1168_v10  ;;  %v1137_v21 = vsub.f32 1.0, %v1136_v13  ;;  %1238 = vadd.xlane.f32.xlu2 %v1226_v24  ;;  %v1133_v39 = vsel %vm2169_vm10, %v1132_v32, %v1128_v19 }
 0x32a   : > { %v1628_v26 = vpop.eup %1627  ;;  %v1089_v28 = vadd.f32 1.0, %v1626_v17  ;;  %v1212_v42 = vmul.f32 %v1133_v39, %v2103_v62  ;;  %v1192_v9 = vor.u32 1.1754944e-38, %v1191_v38 }
 0x32b   : > { %v1173_v23 = vsel %vm1172_vm12, %v1622_v29, %v1169_v18  ;;  %v1138_v30 = vmul.f32 %v1624_v6, %v1137_v21  ;;  %v1181_v31 = vmul.f32 %v1628_v26, %v2148_v60  ;;  %vm1186_vm1 = vweird.f32 %v1628_v26 }
 0x32c   : > { %v1178_v58 = vsel %vm2164_vm9, %v1177_v54, %v1173_v23  ;;  %1629 = vrcp.f32 %v1089_v28  ;;  %v1224_v45 = vmul.f32 %v2126_v27, %v1212_v42  ;;  %vm1187_vm3 = vmor %vm1185_vm2, %vm1186_vm1  ;;  %v1204_v57 = vand.u32 2147483647, %v1089_v28 }
 0x32d   : > { %v1215_v33 = vmul.f32 %v1178_v58, %v2107_v3  ;;  %v1139_v34 = vadd.f32 %v1624_v6, %v1138_v30  ;;  %v1182_v35 = vsub.f32 1.0, %v1181_v31  ;;  %v1206_v29 = vand.u32 2147483648, %v1089_v28 }
 0x32e   : > { %1234 = vadd.xlane.f32.xlu1 %v1224_v45  ;;  %vm1200_vm6 = vweird.f32 %v1089_v28  ;;  %vm1205_vm8 = vcmp.eq.f32.partialorder %v1204_v57, 8.507059e+37  ;;  %vm1258_vm9 = vcmask 7168  }
 0x32f   : > { %v1143_v40 = vsel %vm1142_vm0, %v1624_v6, %v1139_v34  ;;  %v1183_v41 = vmul.f32 %v1628_v26, %v1182_v35  ;;  %v1227_v3 = vmul.f32 %v2126_v27, %v1215_v33 }
 0x330   : > { %v1148_v43 = vsel %vm1145_vm15, %v1147_v36, %v1143_v40 }
 0x331   : > { %v1184_v44 = vadd.f32 %v1628_v26, %v1183_v41  ;;  %v1213_v50 = vmul.f32 %v1148_v43, %v2113_v11  ;;  %1240 = vadd.xlane.f32.xlu2 %v1227_v3  ;;  %v1207_v11 = vor.u32 1.1754944e-38, %v1206_v29 }
 0x332   : > { %v1630_v47 = vpop.eup %1629 }
 0x333   : > { %v1188_v51 = vsel %vm1187_vm3, %v1628_v26, %v1184_v44  ;;  %v1196_v52 = vmul.f32 %v1630_v47, %v1089_v28  ;;  %vm1201_vm5 = vweird.f32 %v1630_v47  ;;  %v1225_v60 = vmul.f32 %v2126_v27, %v1213_v50 }
 0x334   : > { %v1193_v55 = vsel %vm1190_vm4, %v1192_v9, %v1188_v51  ;;  %vm1202_vm7 = vmor %vm1200_vm6, %vm1201_vm5 }
 0x335   : > { %v1216_v62 = vmul.f32 %v1193_v55, %v2120_v20  ;;  %v1197_v56 = vsub.f32 1.0, %v1196_v52 }
 0x336   : > { %1236 = vadd.xlane.f32.xlu1 %v1225_v60 }
 0x337   : > { %v1198_v48 = vmul.f32 %v1630_v47, %v1197_v56  ;;  %v1228_v61 = vmul.f32 %v2126_v27, %v1216_v62 }
 0x339   : > { %v1199_v63 = vadd.f32 %v1630_v47, %v1198_v48  ;;  %1242 = vadd.xlane.f32.xlu0 %v1228_v61 }
 0x33b   : > { %v1203_v0 = vsel %vm1202_vm7, %v1630_v47, %v1199_v63 }
 0x33c   : > { %v1208_v20 = vsel %vm1205_vm8, %v1207_v11, %v1203_v0 }
 0x33d   : > { %v1217_v53 = vmul.f32 %v1208_v20, %v2141_v4 }
 0x33f   : > { %v1229_v46 = vmul.f32 %v2126_v27, %v1217_v53 }
 0x341   : > { %1244 = vadd.xlane.f32.xlu1 %v1229_v46 }
 0x390   : > { %v1231_v2 = vpop.xlane.xlu0 %1230 }
 0x391   : > { %v1250_v5 = vadd.f32 %v1566_v1, %v1231_v2 }
 0x393   : > { %1259 = vst.msk [vmem:[%s1894_s25] sm:$0xff] %vm1258_vm9, %v1250_v5 }
 0x398   : > { %v1233_v6 = vpop.xlane.xlu0 %1232 }
 0x399   : > { %v1251_v7 = vadd.f32 %v1566_v1, %v1233_v6 }
 0x39b   : > { %1260 = vst.msk [vmem:[%s1894_s25 + $0x8] sm:$0xff] %vm1258_vm9, %v1251_v7 }
 0x39c   : > { %v1239_v8 = vpop.xlane.xlu2 %1238 }
 0x39d   : > { %v1254_v49 = vadd.f32 %v1566_v1, %v1239_v8 }
 0x39f   : > { %1263 = vst.msk [vmem:[%s1894_s25 + $0x20] sm:$0xff] %vm1258_vm9, %v1254_v49 }
 0x3a1   : > { %v1235_v27 = vpop.xlane.xlu1 %1234 }
 0x3a2   : > { %v1252_v10 = vadd.f32 %v1566_v1, %v1235_v27 }
 0x3a4   : > { %v1241_v4 = vpop.xlane.xlu2 %1240  ;;  %1261 = vst.msk [vmem:[%s1894_s25 + $0x10] sm:$0xff] %vm1258_vm9, %v1252_v10 }
 0x3a5   : > { %v1255_v13 = vadd.f32 %v1566_v1, %v1241_v4 }
 0x3a7   : > { %1264 = vst.msk [vmem:[%s1894_s25 + $0x28] sm:$0xff] %vm1258_vm9, %v1255_v13 }
 0x3a9   : > { %v1237_v12 = vpop.xlane.xlu1 %1236 }
 0x3aa   : > { %v1253_v16 = vadd.f32 %v1566_v1, %v1237_v12 }
 0x3ac   : > { %v1243_v14 = vpop.xlane.xlu0 %1242  ;;  %1262 = vst.msk [vmem:[%s1894_s25 + $0x18] sm:$0xff] %vm1258_vm9, %v1253_v16 }
 0x3ad   : > { %v1256_v15 = vadd.f32 %v1566_v1, %v1243_v14 }
 0x3af   : > { %1265 = vst.msk [vmem:[%s1894_s25 + $0x30] sm:$0xff] %vm1258_vm9, %v1256_v15 }
 0x3b4   : > { %v1245_v17 = vpop.xlane.xlu1 %1244 }
 0x3b5   : > { %v1257_v18 = vadd.f32 %v1566_v1, %v1245_v17 }
 0x3b7   : > { %1266 = vst.msk [vmem:[%s1894_s25 + $0x38] sm:$0xff] %vm1258_vm9, %v1257_v18 }
 0x3b8 PF: > { %s25_s23 = sadd.s32 1, %s1737_s23   ;;  %s2271_s17 = sld [smem:[#allocation10_spill]] }
 0x3b9   : > { %p22_p13 = scmp.ge.s32.totalorder %s25_s23, 10   ;;  %s2272_s18 = sld [smem:[#allocation11_spill]] }
 0x3ba   : > { %s2273_s19 = smov %s1729_s21  ;;  %s2274_s20 = smov %s1733_s22 }
 0x3bb   :  { %24 = sbr.rel (!%p22_p13) target bundleno = 7 (0x7), region = 117 }
 0x3be   : > { %s2275_s21 = smov %s2271_s17 }
 0x3bf   : > { %s2276_s22 = smov %s2272_s18 }
 0x3c0   :  { %1289 = vsyncpa [#allocation5], 1 }
 0x3c1   :  { %1291 = vsyncpa [#allocation5 + $0x1], 1 }
 0x3c2   :  { %1292 = vsyncpa [#allocation7], 1 }

</bundles_post_ra>
